<compile_context>
chip_gen: v7x
topology: tpu7x:2x2x1
jax: 0.10.0
libtpu: 0.0.40
codegen_flags: <defaults>
</compile_context>

<pallas_src>
import functools

import jax
import jax.numpy as jnp
from jax.experimental import pallas as pl
from jax.experimental.pallas import tpu as pltpu


def _round_up(n, m):
    return ((n + m - 1) // m) * m


def _leaky_relu_02(x):
    # slope < 1  =>  max(x, 0.2*x) == where(x > 0, x, 0.2*x). One VPU max.
    return jnp.maximum(x, 0.2 * x)


def _auto_block_b(B, input_dim, hidden_dim, head_pad, in_bytes):
    """Batch tile: multiple of 8; >=4 grid steps for mid-range batches
    (>=2 per TC on v7x megacore); up to 8192 rows for large batches, bounded
    by a conservative VMEM budget (double-buffered I/O + f32 intermediates)."""
    full = _round_up(B, 8)
    if B <= 32:
        return full
    # Rough per-row VMEM footprint: double-buffered x + out blocks, plus f32
    # intermediate activations inside the kernel.
    row_bytes = (2 * input_dim * in_bytes          # x block, double-buffered
                 + 2 * head_pad * 4                # out block, double-buffered
                 + 4 * hidden_dim * 4)             # f32 intermediates (slack)
    budget = 24 * 1024 * 1024                      # safe under v7x 32 MiB scoped
    cap = (budget // max(row_bytes, 1)) // 8 * 8
    cap = max(256, min(8192, cap))
    bb = _round_up(pl.cdiv(B, 4), 8)               # target >= 4 grid steps
    return max(8, min(bb, cap, full))


def encoder_kernel(x_ref, w1_ref, w2_ref, wh_ref, b_ref, out_ref, *,
                   hidden_dim, compute_dtype):
    # Packed biases stay f32; all elementwise math is f32 (v5e-safe).
    b = b_ref[...]
    b1 = b[:, :hidden_dim]
    b2 = b[:, hidden_dim:2 * hidden_dim]
    bh = b[:, 2 * hidden_dim:]                     # padded head bias (zeros in pad)

    x = x_ref[...].astype(compute_dtype)

    # fc1 + LeakyReLU(0.2)
    h = jnp.dot(x, w1_ref[...], preferred_element_type=jnp.float32) + b1
    h = _leaky_relu_02(h)

    # fc2 + LeakyReLU(0.2)
    h = jnp.dot(h.astype(compute_dtype), w2_ref[...],
                preferred_element_type=jnp.float32) + b2
    h = _leaky_relu_02(h)

    # fused (and lane-padded) fc_mu || fc_logvar head -> lane-dense output slab
    out = jnp.dot(h.astype(compute_dtype), wh_ref[...],
                  preferred_element_type=jnp.float32) + bh
    out_ref[...] = out.astype(out_ref.dtype)


def pack_encoder_params(params, use_bf16_matmul=True):
    """One-time pre-packing (call OUTSIDE the steady-state path):
      * casts matmul weights to bf16 (optional),
      * fuses fc_mu || fc_logvar into one head, zero-padded to 128 lanes,
      * packs all biases into a single (1, 2*hidden + head_pad) f32 row.
    Weights are stored (in, out), i.e. transposed relative to PyTorch."""
    compute_dtype = jnp.bfloat16 if use_bf16_matmul else jnp.float32

    def as_row(b):
        return jnp.asarray(b, jnp.float32).reshape(1, -1)   # defensive (n,)->(1,n)

    latent_dim = params["w_mu"].shape[1]
    head_dim = 2 * latent_dim
    head_pad = _round_up(head_dim, 128)

    w1 = jnp.asarray(params["w1"]).astype(compute_dtype)
    w2 = jnp.asarray(params["w2"]).astype(compute_dtype)

    w_head = jnp.concatenate([jnp.asarray(params["w_mu"], jnp.float32),
                              jnp.asarray(params["w_lv"], jnp.float32)], axis=1)
    b_head = jnp.concatenate([as_row(params["b_mu"]), as_row(params["b_lv"])], axis=1)
    if head_pad > head_dim:
        w_head = jnp.pad(w_head, ((0, 0), (0, head_pad - head_dim)))
        b_head = jnp.pad(b_head, ((0, 0), (0, head_pad - head_dim)))
    w_head = w_head.astype(compute_dtype)

    b_packed = jnp.concatenate([as_row(params["b1"]), as_row(params["b2"]),
                                b_head], axis=1)             # stays f32

    return dict(w1=w1, w2=w2, w_head=w_head, b_packed=b_packed)


@functools.partial(jax.jit, static_argnames=("latent_dim", "block_b"))
def encoder_forward(x, packed, *, latent_dim, block_b=None):
    """Fused Encoder forward.

    x:      (B, input_dim) float32 (or bf16)
    packed: output of pack_encoder_params
    Returns (mu, log_var), each (B, latent_dim), in x.dtype.
    """
    w1, w2, w_head, b_packed = (packed["w1"], packed["w2"],
                                packed["w_head"], packed["b_packed"])
    B, input_dim = x.shape
    hidden_dim = w1.shape[1]
    head_pad = w_head.shape[1]
    compute_dtype = w1.dtype

    if block_b is None:
        block_b = _auto_block_b(B, input_dim, hidden_dim, head_pad,
                                x.dtype.itemsize)
    # Defensive: multiple of 8, never larger than the (padded) batch.
    block_b = max(8, min(_round_up(block_b, 8), _round_up(B, 8)))

    grid = (pl.cdiv(B, block_b),)

    kernel = functools.partial(encoder_kernel,
                               hidden_dim=hidden_dim,
                               compute_dtype=compute_dtype)

    def resident(shape):
        # Grid-invariant full block: weights / biases stay resident in VMEM.
        return pl.BlockSpec(shape, lambda i: (0, 0))

    out = pl.pallas_call(
        kernel,
        out_shape=jax.ShapeDtypeStruct((B, head_pad), x.dtype),
        grid_spec=pltpu.PrefetchScalarGridSpec(
            num_scalar_prefetch=0,
            grid=grid,
            in_specs=[
                pl.BlockSpec((block_b, input_dim), lambda i: (i, 0)),
                resident(w1.shape),
                resident(w2.shape),
                resident(w_head.shape),
                resident(b_packed.shape),
            ],
            out_specs=pl.BlockSpec((block_b, head_pad), lambda i: (i, 0)),
        ),
        compiler_params=pltpu.CompilerParams(
            dimension_semantics=("parallel",)),
    )(x, w1, w2, w_head, b_packed)

    mu = out[:, :latent_dim]
    log_var = out[:, latent_dim:2 * latent_dim]
    return mu, log_var


def init_encoder_params(key, input_dim, hidden_dim, latent_dim):
    """Deterministic init mimicking PyTorch nn.Linear (uniform +-1/sqrt(fan_in)).
    Weights are stored transposed relative to PyTorch, as (in, out)."""
    ks = jax.random.split(key, 8)

    def linear(kw, kb, fan_in, fan_out):
        bound = 1.0 / jnp.sqrt(float(fan_in))
        w = jax.random.uniform(kw, (fan_in, fan_out), jnp.float32, -bound, bound)
        b = jax.random.uniform(kb, (1, fan_out), jnp.float32, -bound, bound)
        return w, b

    w1, b1 = linear(ks[0], ks[1], input_dim, hidden_dim)
    w2, b2 = linear(ks[2], ks[3], hidden_dim, hidden_dim)
    w_mu, b_mu = linear(ks[4], ks[5], hidden_dim, latent_dim)
    w_lv, b_lv = linear(ks[6], ks[7], hidden_dim, latent_dim)
    return dict(w1=w1, b1=b1, w2=w2, b2=b2,
                w_mu=w_mu, b_mu=b_mu, w_lv=w_lv, b_lv=b_lv)


def encoder_reference(x, p):
    """Pure-JAX f32 reference mirroring the PyTorch forward."""
    h = jax.nn.leaky_relu(x @ p["w1"] + p["b1"], negative_slope=0.2)
    h = jax.nn.leaky_relu(h @ p["w2"] + p["b2"], negative_slope=0.2)
    mu = h @ p["w_mu"] + p["b_mu"]
    log_var = h @ p["w_lv"] + p["b_lv"]
    return mu, log_var


if __name__ == "__main__":
    # Small shapes consistent with the module: input_dim=16, hidden_dim=32,
    # latent_dim=8; batch=256 so the auto tile (64 rows) gives 4 grid steps
    # (>=2 per TensorCore on v7x).
    B, INPUT_DIM, HIDDEN_DIM, LATENT_DIM = 256, 16, 32, 8

    key = jax.random.PRNGKey(0)
    k_x, k_p = jax.random.split(key)

    x = jax.random.normal(k_x, (B, INPUT_DIM), dtype=jnp.float32)
    params = init_encoder_params(k_p, INPUT_DIM, HIDDEN_DIM, LATENT_DIM)

    mu_ref, lv_ref = encoder_reference(x, params)

    # 1) f32-operand path: must match the reference tightly.
    packed_f32 = pack_encoder_params(params, use_bf16_matmul=False)
    mu32, lv32 = encoder_forward(x, packed_f32, latent_dim=LATENT_DIM)
    jax.block_until_ready((mu32, lv32))
    assert mu32.shape == (B, LATENT_DIM) and lv32.shape == (B, LATENT_DIM)
    assert jnp.allclose(mu32, mu_ref, atol=1e-5, rtol=1e-5)
    assert jnp.allclose(lv32, lv_ref, atol=1e-5, rtol=1e-5)

    # 2) default bf16-operand path (f32 accumulation): looser tolerance.
    packed_bf16 = pack_encoder_params(params, use_bf16_matmul=True)
    mu, log_var = encoder_forward(x, packed_bf16, latent_dim=LATENT_DIM)
    jax.block_until_ready((mu, log_var))
    assert mu.shape == (B, LATENT_DIM) and log_var.shape == (B, LATENT_DIM)
    assert jnp.allclose(mu, mu_ref, atol=2e-2, rtol=2e-2)
    assert jnp.allclose(log_var, lv_ref, atol=2e-2, rtol=2e-2)

    print("KERNEL_OK")
</pallas_src>

<mosaic_0001>
module attributes {stable_mosaic.version = 11 : i64} {
  func.func @encoder_kernel(%arg0: i32, %arg1: memref<64x16xf32, #tpu.memory_space<vmem>>, %arg2: memref<16x32xf32, #tpu.memory_space<vmem>>, %arg3: memref<32x32xf32, #tpu.memory_space<vmem>>, %arg4: memref<32x128xf32, #tpu.memory_space<vmem>>, %arg5: memref<1x192xf32, #tpu.memory_space<vmem>>, %arg6: memref<64x128xf32, #tpu.memory_space<vmem>>) attributes {dimension_semantics = [#tpu.dimension_semantics<parallel>], iteration_bounds = array<i64: 4>, scalar_prefetch = 0 : i64, scratch_operands = 0 : i64, tpu.core_type = #tpu.core_type<tc>, window_params = [{transform_indices = @transform_0, window_bounds = array<i64: 64, 16>}, {pipeline_mode = #tpu.pipeline_mode<synchronous>, transform_indices = @transform_1, window_bounds = array<i64: 16, 32>}, {pipeline_mode = #tpu.pipeline_mode<synchronous>, transform_indices = @transform_2, window_bounds = array<i64: 32, 32>}, {pipeline_mode = #tpu.pipeline_mode<synchronous>, transform_indices = @transform_3, window_bounds = array<i64: 32, 128>}, {pipeline_mode = #tpu.pipeline_mode<synchronous>, transform_indices = @transform_4, window_bounds = array<i64: 1, 192>}, {transform_indices = @transform_5, window_bounds = array<i64: 64, 128>}]} {
    %c0 = arith.constant 0 : index
    %c0_0 = arith.constant 0 : index
    %0 = vector.load %arg5[%c0, %c0_0] : memref<1x192xf32, #tpu.memory_space<vmem>>, vector<1x192xf32>
    %1 = vector.extract_strided_slice %0 {offsets = [0, 0], sizes = [1, 32], strides = [1, 1]} : vector<1x192xf32> to vector<1x32xf32>
    %2 = vector.extract_strided_slice %0 {offsets = [0, 32], sizes = [1, 32], strides = [1, 1]} : vector<1x192xf32> to vector<1x32xf32>
    %3 = vector.extract_strided_slice %0 {offsets = [0, 64], sizes = [1, 128], strides = [1, 1]} : vector<1x192xf32> to vector<1x128xf32>
    %c0_1 = arith.constant 0 : index
    %c0_2 = arith.constant 0 : index
    %4 = vector.load %arg1[%c0_1, %c0_2] : memref<64x16xf32, #tpu.memory_space<vmem>>, vector<64x16xf32>
    %c0_3 = arith.constant 0 : index
    %c0_4 = arith.constant 0 : index
    %5 = vector.load %arg2[%c0_3, %c0_4] : memref<16x32xf32, #tpu.memory_space<vmem>>, vector<16x32xf32>
    %cst = arith.constant dense<0.000000e+00> : vector<64x32xf32>
    %6 = tpu.matmul %4, %5, %cst {dimension_numbers = #tpu.dot_dimension_numbers<[1], [0], [0], [1], [0, 0, 1, 1], [], []>} : vector<64x16xf32>, vector<16x32xf32>, vector<64x32xf32> -> vector<64x32xf32>
    %7 = vector.broadcast %1 : vector<1x32xf32> to vector<64x32xf32>
    %8 = arith.addf %6, %7 : vector<64x32xf32>
    %cst_5 = arith.constant 2.000000e-01 : f32
    %9 = vector.broadcast %cst_5 : f32 to vector<64x32xf32>
    %10 = arith.mulf %9, %8 : vector<64x32xf32>
    %11 = arith.maximumf %8, %10 : vector<64x32xf32>
    %c0_6 = arith.constant 0 : index
    %c0_7 = arith.constant 0 : index
    %12 = vector.load %arg3[%c0_6, %c0_7] : memref<32x32xf32, #tpu.memory_space<vmem>>, vector<32x32xf32>
    %cst_8 = arith.constant dense<0.000000e+00> : vector<64x32xf32>
    %13 = tpu.matmul %11, %12, %cst_8 {dimension_numbers = #tpu.dot_dimension_numbers<[1], [0], [0], [1], [0, 0, 1, 1], [], []>} : vector<64x32xf32>, vector<32x32xf32>, vector<64x32xf32> -> vector<64x32xf32>
    %14 = vector.broadcast %2 : vector<1x32xf32> to vector<64x32xf32>
    %15 = arith.addf %13, %14 : vector<64x32xf32>
    %cst_9 = arith.constant 2.000000e-01 : f32
    %16 = vector.broadcast %cst_9 : f32 to vector<64x32xf32>
    %17 = arith.mulf %16, %15 : vector<64x32xf32>
    %18 = arith.maximumf %15, %17 : vector<64x32xf32>
    %c0_10 = arith.constant 0 : index
    %c0_11 = arith.constant 0 : index
    %19 = vector.load %arg4[%c0_10, %c0_11] : memref<32x128xf32, #tpu.memory_space<vmem>>, vector<32x128xf32>
    %cst_12 = arith.constant dense<0.000000e+00> : vector<64x128xf32>
    %20 = tpu.matmul %18, %19, %cst_12 {dimension_numbers = #tpu.dot_dimension_numbers<[1], [0], [0], [1], [0, 0, 1, 1], [], []>} : vector<64x32xf32>, vector<32x128xf32>, vector<64x128xf32> -> vector<64x128xf32>
    %21 = vector.broadcast %3 : vector<1x128xf32> to vector<64x128xf32>
    %22 = arith.addf %20, %21 : vector<64x128xf32>
    %c0_13 = arith.constant 0 : index
    %c0_14 = arith.constant 0 : index
    %23 = vector.load %arg6[%c0_13, %c0_14] : memref<64x128xf32, #tpu.memory_space<vmem>>, vector<64x128xf32>
    tpu.vector_store %arg6[%c0_13, %c0_14], %22 {strides = array<i32>} : memref<64x128xf32, #tpu.memory_space<vmem>>, vector<64x128xf32>,
    return
  }
  func.func @transform_0(%arg0: i32) -> (i32, i32) {
    %c0_i32 = arith.constant 0 : i32
    %c0_i32_0 = arith.constant 0 : i32
    return %arg0, %c0_i32 : i32, i32
  }
  func.func @transform_1(%arg0: i32) -> (i32, i32) {
    %c0_i32 = arith.constant 0 : i32
    %c0_i32_0 = arith.constant 0 : i32
    %c0_i32_1 = arith.constant 0 : i32
    return %c0_i32, %c0_i32_0 : i32, i32
  }
  func.func @transform_2(%arg0: i32) -> (i32, i32) {
    %c0_i32 = arith.constant 0 : i32
    %c0_i32_0 = arith.constant 0 : i32
    %c0_i32_1 = arith.constant 0 : i32
    return %c0_i32, %c0_i32_0 : i32, i32
  }
  func.func @transform_3(%arg0: i32) -> (i32, i32) {
    %c0_i32 = arith.constant 0 : i32
    %c0_i32_0 = arith.constant 0 : i32
    %c0_i32_1 = arith.constant 0 : i32
    return %c0_i32, %c0_i32_0 : i32, i32
  }
  func.func @transform_4(%arg0: i32) -> (i32, i32) {
    %c0_i32 = arith.constant 0 : i32
    %c0_i32_0 = arith.constant 0 : i32
    %c0_i32_1 = arith.constant 0 : i32
    return %c0_i32, %c0_i32_0 : i32, i32
  }
  func.func @transform_5(%arg0: i32) -> (i32, i32) {
    %c0_i32 = arith.constant 0 : i32
    %c0_i32_0 = arith.constant 0 : i32
    return %arg0, %c0_i32 : i32, i32
  }
}

</mosaic_0001>

<bundles_post_ra>
// kernel: encoder_forward.1
= control target key start
LH: loop header
LB: loop body
LE: loop exit
PB: predicated region body
PF: predicated region fallthrough
CT: control target
= control target key end

     0   :  { %s949_s18 = smov 0   ;;  %s1030_s0 = inlined_call_operand.vmem [shape: f32[256,16], index: 0, kind: input, shape index: {}]   ;;  %s1031_s1 = inlined_call_operand.vmem [shape: f32[16,32], index: 1, kind: input, shape index: {}]   ;;  %s1032_s2 = inlined_call_operand.vmem [shape: f32[32,32], index: 2, kind: input, shape index: {}]   ;;  %s1033_s3 = inlined_call_operand.vmem [shape: f32[32,128], index: 3, kind: input, shape index: {}]   ;;  %s1034_s4 = inlined_call_operand.vmem [shape: f32[1,192], index: 4, kind: input, shape index: {}]   ;;  %s1035_s5 = inlined_call_operand.vmem [shape: f32[256,128], index: 5, kind: output, shape index: {}]  }
   0x1 LB: > { %s752_s19 = sadd.s32 4294967295, %s915_s18   ;;  %p756_p0 = scmp.ge.s32.totalorder %s915_s18, 1  ;;  %s915_s18 = sphi %s949_s18, %s15_s18  }
   0x2   : > { %p188_p1 = scmp.lt.s32.totalorder %s915_s18, 5 }
   0x4   : > { %p189_p2 = pnand %p756_p0, %p188_p1 }
   0x5   : > { %v237_v0 = vld [vmem:[%s1031_s1] sm:$0xff] (!%p189_p2)  ;;  %v238_v1 = vld [vmem:[%s1031_s1 + $0x8] sm:$0xff] (!%p189_p2)  ;;  %s757_s24 = sshll.u32 (!%p189_p2), %s752_s19, 3  ;;  %vm245_vm0 = vcmask (!%p189_p2), 130048   ;;  %v393_v14 = vld [vmem:[%s1032_s2 + $0x10] sm:$0xff] (!%p189_p2)  ;;  %v240_v17 = vlaneseq (!%p189_p2)  ;;  %s917_s19 = smov (!%p189_p2), 96  }
   0x6   : > { %192 = sbr.rel (%p189_p2) target bundleno = 686 (0x2ae), region = 40  ;;  %v877_v2 = vpack.c.bf16 (!%p189_p2), %v238_v1, %v237_v0  ;;  %p217_p3 = scmp.lt.s32.totalorder (!%p189_p2), %s757_s24, 31  ;;  %v391_v11 = vld [vmem:[%s1032_s2] sm:$0xff] (!%p189_p2)  ;;  %v392_v12 = vld [vmem:[%s1032_s2 + $0x8] sm:$0xff] (!%p189_p2)  ;;  %v394_v15 = vld [vmem:[%s1032_s2 + $0x18] sm:$0xff] (!%p189_p2)  ;;  %vm398_vm1 = vcmask (!%p189_p2), 261120  }
   0x7   : > { %v881_v13 = vpack.c.bf16 (!%p189_p2), %v392_v12, %v391_v11  ;;  %v885_v16 = vpack.c.bf16 (!%p189_p2), %v394_v15, %v393_v14  ;;  %v241_v18 = vshrl.u32 (!%p189_p2), %v240_v17, 7  ;;  %v228_v20 = vld [vmem:[%s1034_s4] sm:$0x3] (!%p189_p2)  ;;  %v545_v23 = vld [vmem:[%s1033_s3 + $0x8] sm:$0xff] (!%p189_p2)  ;;  %v546_v57 = vld [vmem:[%s1033_s3 + $0x10] sm:$0xff] (!%p189_p2)  ;;  %s918_s26 = smov (!%p189_p2), 64  }
   0x8   : > { %878 = vmatprep.subr.bf16.mxu0 (!%p189_p2), %v877_v2  ;;  %897 = vmatprep.subr.bf16.mxu1 (!%p189_p2), %v877_v2  ;;  %v544_v22 = vld [vmem:[%s1033_s3] sm:$0xff] (!%p189_p2)  ;;  %v547_v58 = vld [vmem:[%s1033_s3 + $0x18] sm:$0xff] (!%p189_p2)  ;;  %vm556_vm2 = vcmask (!%p189_p2), 523264  }
   0x9   : > { %880 = vmatpush3.bf16.msra.mxu0 (!%p189_p2), %v877_v2  ;;  %898 = vmatpush3.bf16.msra.mxu1 (!%p189_p2), %v877_v2  ;;  %v242_v19 = vsub.s32 (!%p189_p2), 0, %v241_v18  ;;  %v889_v24 = vpack.c.bf16 (!%p189_p2), %v545_v23, %v544_v22  ;;  %v893_v59 = vpack.c.bf16 (!%p189_p2), %v547_v58, %v546_v57  ;;  %v550_v60 = vsub.s32 (!%p189_p2), 1, %v241_v18 }
   0xa   : > { %882 = vmatprep.subr.bf16.mxu1 (!%p189_p2), %v881_v13 }
   0xb   : > { %v243_v21 = vrot.slane (!%p189_p2), %v228_v20, %v242_v19  ;;  %890 = vmatprep.subr.bf16.mxu0 (!%p189_p2), %v889_v24  ;;  %v551_v61 = vrot.slane (!%p189_p2), %v228_v20, %v550_v60 }
   0xd   : > { %s1037_s24 = smov (!%p217_p3, %s757_s24), 31  ;;  %395 = vrot.lane.b32.xlu0 %v243_v21, %s917_s19  ;;  %554 = vrot.lane.b32.xlu1 %v551_v61, %s918_s26 }
   0xe   : > { %s758_s25 = sshll.u32 %s1037_s24, 3 }
   0xf   : > { %s220_s28 = scalar_lea.vmem %s1030_s0, %s758_s25  ;;  %s226_s29 = scalar_lea.vmem %s1035_s5, %s758_s25 }
  0x10   : > { %v229_v3 = vld [vmem:[%s220_s28] sm:$0xff]  ;;  %v230_v4 = vld [vmem:[%s220_s28 + $0x8] sm:$0xff]  ;;  %v231_v5 = vld [vmem:[%s220_s28 + $0x10] sm:$0xff] }
  0x11   : > { %825 = vmatprep.mubr.msk.f32.mxu0 %vm245_vm0, %v229_v3  ;;  %v233_v6 = vld [vmem:[%s220_s28 + $0x20] sm:$0xff]  ;;  %v234_v7 = vld [vmem:[%s220_s28 + $0x28] sm:$0xff]  ;;  %v235_v8 = vld [vmem:[%s220_s28 + $0x30] sm:$0xff]  ;;  %552 = vrot.lane.b32.xlu0 %v243_v21, %s918_s26 }
  0x12   : > { %826 = vmatmul.mubr.msk.f32.vlgmr.msra.gmra.mrb[0].mxu0 %vm245_vm0, %v230_v4  ;;  %831 = vmatprep.mubr.msk.f32.mxu1 %vm245_vm0, %v233_v6  ;;  %v232_v9 = vld [vmem:[%s220_s28 + $0x18] sm:$0xff] }
  0x13   : > { %828 = vmatprep.mubr.msk.f32.mxu0 %vm245_vm0, %v231_v5  ;;  %832 = vmatmul.mubr.msk.f32.vlgmr.msra.gmra.mrb[0].mxu1 %vm245_vm0, %v234_v7  ;;  %v236_v10 = vld [vmem:[%s220_s28 + $0x38] sm:$0xff] }
  0x14   : > { %834 = vmatprep.mubr.msk.f32.mxu1 %vm245_vm0, %v235_v8  ;;  %884 = vmatpush3.bf16.msra.mxu1 %v881_v13 }
  0x15   : > { %886 = vmatprep.subr.bf16.mxu1 %v885_v16  ;;  %892 = vmatpush3.bf16.msra.mxu0 %v889_v24 }
  0x16   : > { %829 = vmatmul.mubr.msk.f32.gmra.mrb[2].mxu0 %vm245_vm0, %v232_v9  ;;  %894 = vmatprep.subr.bf16.mxu0 %v893_v59 }
  0x17   : > { %835 = vmatmul.mubr.msk.f32.gmra.mrb[2].mxu1 %vm245_vm0, %v236_v10 }
  0x18   : > { %888 = vmatpush3.bf16.msra.mxu1 %v885_v16 }
  0x19   : > { %896 = vmatpush3.bf16.msra.mxu0 %v893_v59 }
  0x7f   : > { %v396_v62 = vpop.permute.xlu0 %395 }
  0xe5   : > { %v827_v25 = vpop.f32.mrb[0].mxu0 }
  0xe6   : > { %v342_v26 = vadd.f32 %v827_v25, %v243_v21  ;;  %v336_v27 = vpop.f32.mrb[1].mxu0  ;;  %v833_v28 = vpop.f32.mrb[0].mxu1 }
  0xe7   : > { %v337_v29 = vadd.f32 %v336_v27, %v243_v21  ;;  %v356_v30 = vpop.f32.mrb[1].mxu1  ;;  %v362_v44 = vadd.f32 %v833_v28, %v243_v21 }
  0xe8   : > { %v376_v31 = vmul.f32 0.2, %v342_v26  ;;  %v357_v32 = vadd.f32 %v356_v30, %v243_v21 }
  0xe9   : > { %v375_v33 = vmul.f32 0.2, %v337_v29  ;;  %v830_v34 = vpop.f32.mrb[2].mxu0  ;;  %v380_v51 = vmul.f32 0.2, %v362_v44 }
  0xea   : > { %v352_v35 = vadd.f32 %v830_v34, %v243_v21  ;;  %v346_v36 = vpop.f32.mrb[3].mxu0  ;;  %v836_v37 = vpop.f32.mrb[2].mxu1  ;;  %v379_v40 = vmul.f32 0.2, %v357_v32  ;;  %v384_v42 = vmax.f32 %v342_v26, %v376_v31 }
  0xeb   : > { %v383_v38 = vmax.f32 %v337_v29, %v375_v33  ;;  %v347_v39 = vadd.f32 %v346_v36, %v243_v21  ;;  %v366_v41 = vpop.f32.mrb[3].mxu1  ;;  %v372_v52 = vadd.f32 %v836_v37, %v243_v21  ;;  %v388_v54 = vmax.f32 %v362_v44, %v380_v51  ;;  %v555_v31 = vpop.permute.xlu1 %554 }
  0xec   : > { %v378_v43 = vmul.f32 0.2, %v352_v35  ;;  %v367_v45 = vadd.f32 %v366_v41, %v243_v21  ;;  %v387_v48 = vmax.f32 %v357_v32, %v379_v40  ;;  %v553_v32 = vpop.permute.xlu0 %552 }
  0xed   : > { %v377_v46 = vmul.f32 0.2, %v347_v39  ;;  %845 = vmatprep.mubr.msk.f32.mxu1 %vm398_vm1, %v383_v38  ;;  %v382_v55 = vmul.f32 0.2, %v372_v52  ;;  %v557_v33 = vsel %vm556_vm2, %v553_v32, %v555_v31 }
  0xee   : > { %846 = vmatmul.mubr.msk.f32.vlgmr.msra.gmra.mrb[4].mxu1 %vm398_vm1, %v384_v42  ;;  %v381_v49 = vmul.f32 0.2, %v367_v45  ;;  %v386_v50 = vmax.f32 %v352_v35, %v378_v43 }
  0xef   : > { %v385_v47 = vmax.f32 %v347_v39, %v377_v46  ;;  %v390_v56 = vmax.f32 %v372_v52, %v382_v55 }
  0xf0   : > { %v389_v53 = vmax.f32 %v367_v45, %v381_v49 }
  0xf1   : > { %848 = vmatprep.mubr.msk.f32.mxu1 %vm398_vm1, %v385_v47 }
  0xf2   : > { %849 = vmatmul.mubr.msk.f32.gmra.mrb[6].mxu1 %vm398_vm1, %v386_v50 }
  0xf3   : > { %851 = vmatprep.mubr.msk.f32.mxu1 %vm398_vm1, %v387_v48 }
  0xf6   : > { %852 = vmatmul.mubr.msk.f32.gmra.mrb[8].mxu1 %vm398_vm1, %v388_v54 }
  0xf7   : > { %854 = vmatprep.mubr.msk.f32.mxu1 %vm398_vm1, %v389_v53 }
  0xfa   : > { %855 = vmatmul.mubr.msk.f32.gmra.mrb[10].mxu1 %vm398_vm1, %v390_v56 }
 0x1c1   : > { %v847_v63 = vpop.f32.mrb[4].mxu1 }
 0x1c2   : > { %v495_v0 = vadd.f32 %v847_v63, %v396_v62  ;;  %v489_v1 = vpop.f32.mrb[5].mxu1 }
 0x1c3   : > { %v490_v2 = vadd.f32 %v489_v1, %v396_v62 }
 0x1c4   : > { %v529_v3 = vmul.f32 0.2, %v495_v0 }
 0x1c5   : > { %v528_v4 = vmul.f32 0.2, %v490_v2  ;;  %v850_v5 = vpop.f32.mrb[6].mxu1 }
 0x1c6   : > { %v505_v6 = vadd.f32 %v850_v5, %v396_v62  ;;  %v499_v7 = vpop.f32.mrb[7].mxu1  ;;  %v537_v10 = vmax.f32 %v495_v0, %v529_v3 }
 0x1c7   : > { %v536_v8 = vmax.f32 %v490_v2, %v528_v4  ;;  %v500_v9 = vadd.f32 %v499_v7, %v396_v62 }
 0x1c8   : > { %v531_v11 = vmul.f32 0.2, %v505_v6 }
 0x1c9   : > { %v530_v12 = vmul.f32 0.2, %v500_v9  ;;  %v853_v13 = vpop.f32.mrb[8].mxu1  ;;  %865 = vmatprep.mubr.msk.f32.mxu0 %vm398_vm1, %v536_v8 }
 0x1ca   : > { %v515_v14 = vadd.f32 %v853_v13, %v396_v62  ;;  %v509_v15 = vpop.f32.mrb[9].mxu1  ;;  %866 = vmatmul.mubr.msk.f32.vlgmr.msra.gmra.mrb[4].mxu0 %vm398_vm1, %v537_v10  ;;  %v539_v18 = vmax.f32 %v505_v6, %v531_v11 }
 0x1cb   : > { %v538_v16 = vmax.f32 %v500_v9, %v530_v12  ;;  %v510_v17 = vadd.f32 %v509_v15, %v396_v62 }
 0x1cc   : > { %v533_v19 = vmul.f32 0.2, %v515_v14 }
 0x1cd   : > { %v532_v20 = vmul.f32 0.2, %v510_v17  ;;  %v856_v21 = vpop.f32.mrb[10].mxu1  ;;  %868 = vmatprep.mubr.msk.f32.mxu0 %vm398_vm1, %v538_v16 }
 0x1ce   : > { %v525_v22 = vadd.f32 %v856_v21, %v396_v62  ;;  %v519_v23 = vpop.f32.mrb[11].mxu1  ;;  %869 = vmatmul.mubr.msk.f32.gmra.mrb[6].mxu0 %vm398_vm1, %v539_v18  ;;  %v541_v26 = vmax.f32 %v515_v14, %v533_v19 }
 0x1cf   : > { %v540_v24 = vmax.f32 %v510_v17, %v532_v20  ;;  %v520_v25 = vadd.f32 %v519_v23, %v396_v62 }
 0x1d0   : > { %v535_v27 = vmul.f32 0.2, %v525_v22 }
 0x1d1   : > { %v534_v28 = vmul.f32 0.2, %v520_v25  ;;  %871 = vmatprep.mubr.msk.f32.mxu0 %vm398_vm1, %v540_v24 }
 0x1d2   : > { %872 = vmatmul.mubr.msk.f32.gmra.mrb[8].mxu0 %vm398_vm1, %v541_v26  ;;  %v543_v30 = vmax.f32 %v525_v22, %v535_v27 }
 0x1d3   : > { %v542_v29 = vmax.f32 %v520_v25, %v534_v28 }
 0x1d5   : > { %874 = vmatprep.mubr.msk.f32.mxu0 %vm398_vm1, %v542_v29 }
 0x1d6   : > { %875 = vmatmul.mubr.msk.f32.gmra.mrb[10].mxu0 %vm398_vm1, %v543_v30 }
 0x29d   : > { %v867_v34 = vpop.f32.mrb[4].mxu0 }
 0x29e   : > { %v655_v35 = vadd.f32 %v867_v34, %v557_v33  ;;  %v649_v36 = vpop.f32.mrb[5].mxu0 }
 0x29f   : > { %v650_v37 = vadd.f32 %v649_v36, %v557_v33 }
 0x2a0   : > { %689 = vst [vmem:[%s226_s29 + $0x8] sm:$0xff] %v655_v35 }
 0x2a1   : > { %688 = vst [vmem:[%s226_s29] sm:$0xff] %v650_v37  ;;  %v870_v38 = vpop.f32.mrb[6].mxu0 }
 0x2a2   : > { %v665_v39 = vadd.f32 %v870_v38, %v557_v33  ;;  %v659_v40 = vpop.f32.mrb[7].mxu0 }
 0x2a3   : > { %v660_v41 = vadd.f32 %v659_v40, %v557_v33 }
 0x2a4   : > { %691 = vst [vmem:[%s226_s29 + $0x18] sm:$0xff] %v665_v39 }
 0x2a5   : > { %690 = vst [vmem:[%s226_s29 + $0x10] sm:$0xff] %v660_v41  ;;  %v873_v42 = vpop.f32.mrb[8].mxu0 }
 0x2a6   : > { %v675_v43 = vadd.f32 %v873_v42, %v557_v33  ;;  %v669_v44 = vpop.f32.mrb[9].mxu0 }
 0x2a7   : > { %v670_v45 = vadd.f32 %v669_v44, %v557_v33 }
 0x2a8   : > { %693 = vst [vmem:[%s226_s29 + $0x28] sm:$0xff] %v675_v43 }
 0x2a9   : > { %692 = vst [vmem:[%s226_s29 + $0x20] sm:$0xff] %v670_v45  ;;  %v876_v46 = vpop.f32.mrb[10].mxu0 }
 0x2aa   : > { %v685_v47 = vadd.f32 %v876_v46, %v557_v33  ;;  %v679_v48 = vpop.f32.mrb[11].mxu0 }
 0x2ab   : > { %v680_v49 = vadd.f32 %v679_v48, %v557_v33 }
 0x2ac   : > { %695 = vst [vmem:[%s226_s29 + $0x38] sm:$0xff] %v685_v47 }
 0x2ad   : > { %694 = vst [vmem:[%s226_s29 + $0x30] sm:$0xff] %v680_v49 }
 0x2ae PF: > { %s15_s18 = sadd.s32 1, %s915_s18  }
 0x2af   : > { %p12_p4 = scmp.ge.s32.totalorder %s15_s18, 6  }
 0x2b1   :  { %14 = sbr.rel (!%p12_p4) target bundleno = 1 (0x1), region = 70 }

</bundles_post_ra>
